<compile_context>
chip_gen: v7x
topology: tpu7x:2x2x1
jax: 0.10.0
libtpu: 0.0.40
codegen_flags: <defaults>
</compile_context>

<pallas_src>
import functools

import jax
import jax.numpy as jnp
from jax.experimental import pallas as pl
from jax.experimental.pallas import tpu as pltpu

LANE = 128       # vreg lane width / MXU column width
MAX_TB = 512     # max batch-tile rows


def _round_up(n: int, m: int) -> int:
    return (n + m - 1) // m * m


def generator_kernel(x_ref, w1_ref, b1_ref, w2_ref, b2_ref, w3_ref, b3_ref, o_ref):
    # input_layer: Linear + ReLU  (bf16 operands on MXU, f32 accumulation)
    h = jnp.dot(x_ref[...], w1_ref[...], preferred_element_type=jnp.float32)
    h = jnp.maximum(h + b1_ref[...], 0.0)
    # hidden_layer: Linear + ReLU
    h = jnp.dot(h.astype(jnp.bfloat16), w2_ref[...], preferred_element_type=jnp.float32)
    h = jnp.maximum(h + b2_ref[...], 0.0)
    # output_layer: Linear + Tanh (tanh uses the EUP slot -> essentially free here)
    h = jnp.dot(h.astype(jnp.bfloat16), w3_ref[...], preferred_element_type=jnp.float32)
    o_ref[...] = jnp.tanh(h + b3_ref[...]).astype(o_ref.dtype)


def prepare_params(w1, b1, w2, b2, w3, b3):
    """One-time repack: pad hidden/output dims to lane multiples, cast weights to bf16.

    Zero weight columns + zero bias -> ReLU(0)=0 -> padded features contribute
    nothing downstream, so the padding is numerically exact.
    Weights stored [in, out]; biases [out] or [1, out].
    """
    K1, H = w1.shape
    N = w3.shape[1]
    Hp = _round_up(H, LANE)
    Np = _round_up(N, LANE)
    bf = jnp.bfloat16
    w1p = jnp.zeros((K1, Hp), bf).at[:, :H].set(w1.astype(bf))
    w2p = jnp.zeros((Hp, Hp), bf).at[:H, :H].set(w2.astype(bf))
    w3p = jnp.zeros((Hp, Np), bf).at[:H, :N].set(w3.astype(bf))
    b1p = jnp.zeros((1, Hp), jnp.float32).at[0, :H].set(b1.reshape(-1))
    b2p = jnp.zeros((1, Hp), jnp.float32).at[0, :H].set(b2.reshape(-1))
    b3p = jnp.zeros((1, Np), jnp.float32).at[0, :N].set(b3.reshape(-1))
    return (w1p, b1p, w2p, b2p, w3p, b3p), N


@functools.partial(jax.jit, static_argnames=("n_out",))
def generator_forward(x, w1p, b1p, w2p, b2p, w3p, b3p, *, n_out):
    """x: [B, noize] float32; prepared (padded, bf16) weights from prepare_params.

    Returns [B, image_size**2] float32, matching torch Generator.forward.
    """
    B, K1 = x.shape
    Np = w3p.shape[1]

    # bf16 input halves the input DMA bytes; matmuls accumulate in f32.
    xb = x.astype(jnp.bfloat16)

    # Batch tiling without padding x or slicing output rows:
    #  - B <= 256: a single full-dim block (block dim == array dim is always legal).
    #  - 256 < B <= 1024: two blocks so both v7x TensorCores get work.
    #  - else: MAX_TB-row tiles; ragged last block is clipped by Pallas (rows are
    #    independent, so undefined pad rows only feed discarded output rows).
    if B <= 256:
        TB = B
    elif B <= 2 * MAX_TB:
        TB = _round_up(pl.cdiv(B, 2), 8)
    else:
        TB = MAX_TB
    # Keep each double-buffered output tile <= ~4 MiB (v7x has only 64 MiB VMEM).
    TB = min(TB, max(8, ((4 << 20) // (Np * 4)) // 8 * 8))
    grid_b = pl.cdiv(B, TB)

    const = lambda i: (0, 0)   # weights/biases stay VMEM-resident across batch tiles

    out = pl.pallas_call(
        generator_kernel,
        out_shape=jax.ShapeDtypeStruct((B, Np), jnp.float32),
        grid_spec=pltpu.PrefetchScalarGridSpec(
            num_scalar_prefetch=0,
            grid=(grid_b,),
            in_specs=[
                pl.BlockSpec((TB, K1), lambda i: (i, 0)),   # batch-tiled bf16 input
                pl.BlockSpec(w1p.shape, const),
                pl.BlockSpec(b1p.shape, const),
                pl.BlockSpec(w2p.shape, const),
                pl.BlockSpec(b2p.shape, const),
                pl.BlockSpec(w3p.shape, const),
                pl.BlockSpec(b3p.shape, const),
            ],
            out_specs=pl.BlockSpec((TB, Np), lambda i: (i, 0)),
        ),
        compiler_params=pltpu.CompilerParams(
            dimension_semantics=("parallel",),   # shards batch tiles across v7x's 2 TCs
        ),
    )(xb, w1p, b1p, w2p, b2p, w3p, b3p)

    if n_out != Np:
        out = out[:, :n_out]
    return out


def init_params(key, noize_size, hidden_size, image_size):
    """Deterministic synthetic init (PyTorch-style uniform(-1/sqrt(fan_in), +))."""
    ks = jax.random.split(key, 6)
    out_dim = image_size ** 2

    def unif(k, shape, fan_in):
        bound = 1.0 / jnp.sqrt(fan_in)
        return jax.random.uniform(k, shape, jnp.float32, -bound, bound)

    w1 = unif(ks[0], (noize_size, hidden_size), noize_size)
    b1 = unif(ks[1], (1, hidden_size), noize_size)
    w2 = unif(ks[2], (hidden_size, hidden_size), hidden_size)
    b2 = unif(ks[3], (1, hidden_size), hidden_size)
    w3 = unif(ks[4], (hidden_size, out_dim), hidden_size)
    b3 = unif(ks[5], (1, out_dim), hidden_size)
    return w1, b1, w2, b2, w3, b3


if __name__ == "__main__":
    noize_size, hidden_size, image_size = 16, 32, 16
    batch = 2

    key = jax.random.PRNGKey(0)
    k_x, k_p = jax.random.split(key)
    x = jax.random.normal(k_x, (batch, noize_size), jnp.float32)
    w1, b1, w2, b2, w3, b3 = init_params(k_p, noize_size, hidden_size, image_size)

    # One-time parameter repack (padding + bf16 cast) outside the jitted forward.
    prepared, n_out = prepare_params(w1, b1, w2, b2, w3, b3)
    prepared = jax.block_until_ready(prepared)

    out = generator_forward(x, *prepared, n_out=n_out)
    jax.block_until_ready(out)

    # cross-check against plain-JAX f32 reference (tolerance relaxed for bf16 MXU operands)
    ref = jnp.maximum(x @ w1 + b1, 0.0)
    ref = jnp.maximum(ref @ w2 + b2, 0.0)
    ref = jnp.tanh(ref @ w3 + b3)
    assert out.shape == (batch, image_size ** 2)
    assert jnp.allclose(out, ref, atol=2e-2, rtol=2e-2)

    print("KERNEL_OK")
</pallas_src>

<mosaic_0001>
module attributes {stable_mosaic.version = 11 : i64} {
  func.func @generator_kernel(%arg0: i32, %arg1: memref<2x16xbf16, #tpu.memory_space<vmem>>, %arg2: memref<16x128xbf16, #tpu.memory_space<vmem>>, %arg3: memref<1x128xf32, #tpu.memory_space<vmem>>, %arg4: memref<128x128xbf16, #tpu.memory_space<vmem>>, %arg5: memref<1x128xf32, #tpu.memory_space<vmem>>, %arg6: memref<128x256xbf16, #tpu.memory_space<vmem>>, %arg7: memref<1x256xf32, #tpu.memory_space<vmem>>, %arg8: memref<2x256xf32, #tpu.memory_space<vmem>>) attributes {dimension_semantics = [#tpu.dimension_semantics<parallel>], iteration_bounds = array<i64: 1>, scalar_prefetch = 0 : i64, scratch_operands = 0 : i64, tpu.core_type = #tpu.core_type<tc>, window_params = [{transform_indices = @transform_0, window_bounds = array<i64: 2, 16>}, {pipeline_mode = #tpu.pipeline_mode<synchronous>, transform_indices = @transform_1, window_bounds = array<i64: 16, 128>}, {pipeline_mode = #tpu.pipeline_mode<synchronous>, transform_indices = @transform_2, window_bounds = array<i64: 1, 128>}, {pipeline_mode = #tpu.pipeline_mode<synchronous>, transform_indices = @transform_3, window_bounds = array<i64: 128, 128>}, {pipeline_mode = #tpu.pipeline_mode<synchronous>, transform_indices = @transform_4, window_bounds = array<i64: 1, 128>}, {pipeline_mode = #tpu.pipeline_mode<synchronous>, transform_indices = @transform_5, window_bounds = array<i64: 128, 256>}, {pipeline_mode = #tpu.pipeline_mode<synchronous>, transform_indices = @transform_6, window_bounds = array<i64: 1, 256>}, {transform_indices = @transform_7, window_bounds = array<i64: 2, 256>}]} {
    %c0 = arith.constant 0 : index
    %c0_0 = arith.constant 0 : index
    %0 = vector.load %arg1[%c0, %c0_0] : memref<2x16xbf16, #tpu.memory_space<vmem>>, vector<2x16xbf16>
    %c0_1 = arith.constant 0 : index
    %c0_2 = arith.constant 0 : index
    %1 = vector.load %arg2[%c0_1, %c0_2] : memref<16x128xbf16, #tpu.memory_space<vmem>>, vector<16x128xbf16>
    %cst = arith.constant dense<0.000000e+00> : vector<2x128xf32>
    %2 = tpu.matmul %0, %1, %cst {dimension_numbers = #tpu.dot_dimension_numbers<[1], [0], [0], [1], [0, 0, 1, 1], [], []>} : vector<2x16xbf16>, vector<16x128xbf16>, vector<2x128xf32> -> vector<2x128xf32>
    %c0_3 = arith.constant 0 : index
    %c0_4 = arith.constant 0 : index
    %3 = vector.load %arg3[%c0_3, %c0_4] : memref<1x128xf32, #tpu.memory_space<vmem>>, vector<1x128xf32>
    %4 = vector.broadcast %3 : vector<1x128xf32> to vector<2x128xf32>
    %5 = arith.addf %2, %4 : vector<2x128xf32>
    %cst_5 = arith.constant 0.000000e+00 : f32
    %6 = vector.broadcast %cst_5 : f32 to vector<2x128xf32>
    %7 = arith.maximumf %5, %6 : vector<2x128xf32>
    %8 = arith.truncf %7 : vector<2x128xf32> to vector<2x128xbf16>
    %c0_6 = arith.constant 0 : index
    %c0_7 = arith.constant 0 : index
    %9 = vector.load %arg4[%c0_6, %c0_7] : memref<128x128xbf16, #tpu.memory_space<vmem>>, vector<128x128xbf16>
    %cst_8 = arith.constant dense<0.000000e+00> : vector<2x128xf32>
    %10 = tpu.matmul %8, %9, %cst_8 {dimension_numbers = #tpu.dot_dimension_numbers<[1], [0], [0], [1], [0, 0, 1, 1], [], []>} : vector<2x128xbf16>, vector<128x128xbf16>, vector<2x128xf32> -> vector<2x128xf32>
    %c0_9 = arith.constant 0 : index
    %c0_10 = arith.constant 0 : index
    %11 = vector.load %arg5[%c0_9, %c0_10] : memref<1x128xf32, #tpu.memory_space<vmem>>, vector<1x128xf32>
    %12 = vector.broadcast %11 : vector<1x128xf32> to vector<2x128xf32>
    %13 = arith.addf %10, %12 : vector<2x128xf32>
    %cst_11 = arith.constant 0.000000e+00 : f32
    %14 = vector.broadcast %cst_11 : f32 to vector<2x128xf32>
    %15 = arith.maximumf %13, %14 : vector<2x128xf32>
    %16 = arith.truncf %15 : vector<2x128xf32> to vector<2x128xbf16>
    %c0_12 = arith.constant 0 : index
    %c0_13 = arith.constant 0 : index
    %17 = vector.load %arg6[%c0_12, %c0_13] : memref<128x256xbf16, #tpu.memory_space<vmem>>, vector<128x256xbf16>
    %cst_14 = arith.constant dense<0.000000e+00> : vector<2x256xf32>
    %18 = tpu.matmul %16, %17, %cst_14 {dimension_numbers = #tpu.dot_dimension_numbers<[1], [0], [0], [1], [0, 0, 1, 1], [], []>} : vector<2x128xbf16>, vector<128x256xbf16>, vector<2x256xf32> -> vector<2x256xf32>
    %c0_15 = arith.constant 0 : index
    %c0_16 = arith.constant 0 : index
    %19 = vector.load %arg7[%c0_15, %c0_16] : memref<1x256xf32, #tpu.memory_space<vmem>>, vector<1x256xf32>
    %20 = vector.broadcast %19 : vector<1x256xf32> to vector<2x256xf32>
    %21 = arith.addf %18, %20 : vector<2x256xf32>
    %22 = math.tanh %21 : vector<2x256xf32>
    %c0_17 = arith.constant 0 : index
    %c0_18 = arith.constant 0 : index
    %23 = vector.load %arg8[%c0_17, %c0_18] : memref<2x256xf32, #tpu.memory_space<vmem>>, vector<2x256xf32>
    tpu.vector_store %arg8[%c0_17, %c0_18], %22 {strides = array<i32>} : memref<2x256xf32, #tpu.memory_space<vmem>>, vector<2x256xf32>,
    return
  }
  func.func @transform_0(%arg0: i32) -> (i32, i32) {
    %c0_i32 = arith.constant 0 : i32
    %c0_i32_0 = arith.constant 0 : i32
    return %arg0, %c0_i32 : i32, i32
  }
  func.func @transform_1(%arg0: i32) -> (i32, i32) {
    %c0_i32 = arith.constant 0 : i32
    %c0_i32_0 = arith.constant 0 : i32
    %c0_i32_1 = arith.constant 0 : i32
    return %c0_i32, %c0_i32_0 : i32, i32
  }
  func.func @transform_2(%arg0: i32) -> (i32, i32) {
    %c0_i32 = arith.constant 0 : i32
    %c0_i32_0 = arith.constant 0 : i32
    %c0_i32_1 = arith.constant 0 : i32
    return %c0_i32, %c0_i32_0 : i32, i32
  }
  func.func @transform_3(%arg0: i32) -> (i32, i32) {
    %c0_i32 = arith.constant 0 : i32
    %c0_i32_0 = arith.constant 0 : i32
    %c0_i32_1 = arith.constant 0 : i32
    return %c0_i32, %c0_i32_0 : i32, i32
  }
  func.func @transform_4(%arg0: i32) -> (i32, i32) {
    %c0_i32 = arith.constant 0 : i32
    %c0_i32_0 = arith.constant 0 : i32
    %c0_i32_1 = arith.constant 0 : i32
    return %c0_i32, %c0_i32_0 : i32, i32
  }
  func.func @transform_5(%arg0: i32) -> (i32, i32) {
    %c0_i32 = arith.constant 0 : i32
    %c0_i32_0 = arith.constant 0 : i32
    %c0_i32_1 = arith.constant 0 : i32
    return %c0_i32, %c0_i32_0 : i32, i32
  }
  func.func @transform_6(%arg0: i32) -> (i32, i32) {
    %c0_i32 = arith.constant 0 : i32
    %c0_i32_0 = arith.constant 0 : i32
    %c0_i32_1 = arith.constant 0 : i32
    return %c0_i32, %c0_i32_0 : i32, i32
  }
  func.func @transform_7(%arg0: i32) -> (i32, i32) {
    %c0_i32 = arith.constant 0 : i32
    %c0_i32_0 = arith.constant 0 : i32
    return %arg0, %c0_i32 : i32, i32
  }
}

</mosaic_0001>

<bundles_post_ra>
// kernel: generator_forward.1
= control target key start
LH: loop header
LB: loop body
LE: loop exit
PB: predicated region body
PF: predicated region fallthrough
CT: control target
= control target key end

     0   :  { %12 = vsyncpa [#allocation3], 0  ;;  %s749_s0 = inlined_call_operand.vmem [shape: bf16[2,16], index: 0, kind: input, shape index: {}]   ;;  %s750_s1 = inlined_call_operand.hbm [shape: bf16[16,128], index: 1, kind: input, shape index: {}]   ;;  %s751_s2 = inlined_call_operand.vmem [shape: f32[1,128], index: 2, kind: input, shape index: {}]   ;;  %s752_s3 = inlined_call_operand.hbm [shape: bf16[128,128], index: 3, kind: input, shape index: {}]   ;;  %s753_s4 = inlined_call_operand.vmem [shape: f32[1,128], index: 4, kind: input, shape index: {}]   ;;  %s754_s5 = inlined_call_operand.hbm [shape: bf16[128,256], index: 5, kind: input, shape index: {}]   ;;  %s755_s6 = inlined_call_operand.vmem [shape: f32[1,256], index: 6, kind: input, shape index: {}]   ;;  %s756_s7 = inlined_call_operand.hbm [shape: f32[2,256], index: 7, kind: output, shape index: {}]  }
   0x1   :  { %13 = vsyncpa [#allocation6], 0 }
   0x2   :  { %14 = vsyncpa [#allocation4], 0  ;;  %s631_s24 = smov [#allocation5]   ;;  %s632_s26 = smov [#allocation2]  }
   0x3   :  { %s36_s25 = sshll.u32 %s631_s24, 4  ;;  %s22_s27 = sshll.u32 %s632_s26, 4  ;;  %s37_s25 = int_to_ptr.vmem [resolvable:$true] %s36_s25  ;;  %s682_s27 = int_to_ptr.vmem [resolvable:$true] %s22_s27 }
   0x4   :  { %s537_s30 = scalar_lea.hbm %s752_s3, 1024 }
   0x5   :  { %p538_p0 = scmp.ne.s32.totalorder %s752_s3, %s537_s30  ;;  %p541_p1 = scmp.lt.u32.totalorder %s537_s30, %s752_s3 }
   0x7   :  { %p543_p2 = pnand %p541_p1, %p538_p0 }
   0x9   :  { %546 = shalt.err (!%p543_p2)
}
   0xa   :  { %s547_s12 = scalar_lea.vmem %s37_s25, 1024  ;;  %p552_p4 = scmp.lt.s32.totalorder %s37_s25, %s37_s25 }
   0xb   :  { %p548_p3 = scmp.ne.s32.totalorder %s37_s25, %s547_s12  ;;  %p553_p5 = scmp.lt.s32.totalorder %s547_s12, %s547_s12 }
   0xd   :  { %p554_p6 = por %p553_p5, %p552_p4 }
   0xf   :  { %p555_p7 = pnand %p554_p6, %p548_p3 }
  0x11   :  { %558 = shalt.err (!%p555_p7)
}
  0x12   :  { %s633_s13 = smov 64   ;;  %s634_s14 = smov 4  }
  0x13   :  { %42 = dma.hbm_to_vmem [thread:$0]  %s752_s3, 1024, %s37_s25, [#allocation6], %s633_s13, %s633_s13, %s634_s14  }
  0x14   :  { %s559_s19 = scalar_lea.hbm %s750_s1, 128 }
  0x15   :  { %p560_p8 = scmp.ne.s32.totalorder %s750_s1, %s559_s19  ;;  %p563_p9 = scmp.lt.u32.totalorder %s559_s19, %s750_s1 }
  0x17   :  { %p565_p10 = pnand %p563_p9, %p560_p8 }
  0x19   :  { %568 = shalt.err (!%p565_p10)
}
  0x1a   :  { %s569_s24 = scalar_lea.vmem %s682_s27, 128  ;;  %p574_p12 = scmp.lt.s32.totalorder %s682_s27, %s682_s27 }
  0x1b   :  { %p570_p11 = scmp.ne.s32.totalorder %s682_s27, %s569_s24  ;;  %p575_p13 = scmp.lt.s32.totalorder %s569_s24, %s569_s24 }
  0x1d   :  { %p576_p0 = por %p575_p13, %p574_p12 }
  0x1f   :  { %p577_p1 = pnand %p576_p0, %p570_p11 }
  0x21   :  { %580 = shalt.err (!%p577_p1)
}
  0x22   :  { %28 = dma.hbm_to_vmem [thread:$0]  %s750_s1, 128, %s682_s27, [#allocation3], %s633_s13, %s633_s13, %s634_s14  }
  0x23   :  { %s635_s26 = smov [#allocation7]   ;;  %s581_s8 = scalar_lea.hbm %s754_s5, 2048 }
  0x24   :  { %s50_s28 = sshll.u32 %s635_s26, 4  ;;  %p582_p2 = scmp.ne.s32.totalorder %s754_s5, %s581_s8  ;;  %s51_s28 = int_to_ptr.vmem [resolvable:$true] %s50_s28 }
  0x25   :  { %p585_p3 = scmp.lt.u32.totalorder %s581_s8, %s754_s5 }
  0x27   :  { %p587_p4 = pnand %p585_p3, %p582_p2 }
  0x29   :  { %590 = shalt.err (!%p587_p4)
}
  0x2a   :  { %s591_s15 = scalar_lea.vmem %s51_s28, 2048  ;;  %p596_p6 = scmp.lt.s32.totalorder %s51_s28, %s51_s28 }
  0x2b   :  { %p592_p5 = scmp.ne.s32.totalorder %s51_s28, %s591_s15  ;;  %p597_p7 = scmp.lt.s32.totalorder %s591_s15, %s591_s15 }
  0x2d   :  { %p598_p8 = por %p597_p7, %p596_p6 }
  0x2f   :  { %p599_p9 = pnand %p598_p8, %p592_p5 }
  0x31   :  { %602 = shalt.err (!%p599_p9)
}
  0x32   :  { %s636_s1 = smov 128   ;;  %s637_s27 = smov 8  }
  0x33   :  { %56 = dma.hbm_to_vmem [thread:$0]  %s754_s5, 2048, %s51_s28, [#allocation6], %s636_s1, %s636_s1, %s637_s27  }
  0x34   :  { %625 = dma.done.wait [#allocation3], 128  }
  0x35   :  { %626 = vsyncadd [#allocation3], 4294967168 }
  0x36   :  { %627 = dma.done.wait [#allocation6], 3072  }
  0x37   :  { %628 = vsyncadd [#allocation6], 4294964224  ;;  %v638_v0 = vmov 0.0   ;;  %vm639_vm0 = vmmov 0   ;;  %v500_v1 = vld [vmem:[#allocation2] sm:$0xff]   ;;  %vm85_vm1 = vcmask 130048   ;;  %v262_v44 = vlaneseq }
  0x38   :  { %463 = vmatprep.subr.bf16.mxu0 %v638_v0  ;;  %465 = vmatprep.mubr.msk.bf16.mxu0 %vm639_vm0, %v638_v0  ;;  %v69_v2 = vld [vmem:[%s749_s0] sm:$0x1]  ;;  %v501_v3 = vld [vmem:[#allocation5] sm:$0xff]   ;;  %v502_v4 = vld [vmem:[#allocation5 + $0x8] sm:$0xff]   ;;  %v640_v35 = vmov 0  }
  0x39   :  { %469 = vmatprep.subr.bf16.mxu1 %v638_v0  ;;  %485 = vmatprep.mubr.msk.bf16.mxu1 %vm639_vm0, %v638_v0  ;;  %v503_v5 = vld [vmem:[#allocation5 + $0x10] sm:$0xff]   ;;  %v504_v6 = vld [vmem:[#allocation5 + $0x18] sm:$0xff]   ;;  %v505_v7 = vld [vmem:[#allocation5 + $0x20] sm:$0xff]   ;;  %v263_v45 = vshrl.u32 %v262_v44, 7 }
  0x3a   :  { %464 = vmatpush3.bf16.msra.mxu0 %v500_v1  ;;  %470 = vmatpush3.bf16.msra.mxu1 %v501_v3  ;;  %v506_v8 = vld [vmem:[#allocation5 + $0x28] sm:$0xff]   ;;  %v507_v9 = vld [vmem:[#allocation5 + $0x30] sm:$0xff]   ;;  %v508_v10 = vld [vmem:[#allocation5 + $0x38] sm:$0xff]  }
  0x3b   :  { %471 = vmatprep.subr.bf16.mxu1 %v638_v0  ;;  %v509_v11 = vld [vmem:[#allocation7] ss:$8 sps:$4 sm:$0xff]   ;;  %v511_v12 = vld [vmem:[#allocation7 + $0x4] ss:$8 sps:$4 sm:$0xff]   ;;  %v514_v13 = vld [vmem:[#allocation7 + $0x14] ss:$8 sps:$4 sm:$0xff]  }
  0x3c   :  { %352 = vmatprep.subr.bf16.mxu0 %v511_v12  ;;  %v512_v14 = vld [vmem:[#allocation7 + $0x10] ss:$8 sps:$4 sm:$0xff]   ;;  %v517_v15 = vld [vmem:[#allocation7 + $0x24] ss:$8 sps:$4 sm:$0xff]   ;;  %v515_v16 = vld [vmem:[#allocation7 + $0x20] ss:$8 sps:$4 sm:$0xff]  }
  0x3d   :  { %466 = vmatmul.mubr.msk.bf16.vlgmr.msra.gmra.mrb[0].mxu0 %vm85_vm1, %v69_v2  ;;  %v520_v17 = vld [vmem:[#allocation7 + $0x34] ss:$8 sps:$4 sm:$0xff]   ;;  %v518_v18 = vld [vmem:[#allocation7 + $0x30] ss:$8 sps:$4 sm:$0xff]   ;;  %v523_v19 = vld [vmem:[#allocation7 + $0x44] ss:$8 sps:$4 sm:$0xff]  }
  0x3e   :  { %472 = vmatpush3.bf16.msra.mxu1 %v502_v4  ;;  %353 = vmatpush1.bf16.msra.mxu0 %v509_v11  ;;  %v521_v20 = vld [vmem:[#allocation7 + $0x40] ss:$8 sps:$4 sm:$0xff]   ;;  %v526_v21 = vld [vmem:[#allocation7 + $0x54] ss:$8 sps:$4 sm:$0xff]   ;;  %v524_v22 = vld [vmem:[#allocation7 + $0x50] ss:$8 sps:$4 sm:$0xff]  }
  0x3f   :  { %473 = vmatprep.subr.bf16.mxu1 %v638_v0  ;;  %354 = vmatprep.subr.bf16.mxu0 %v514_v13  ;;  %v529_v23 = vld [vmem:[#allocation7 + $0x64] ss:$8 sps:$4 sm:$0xff]   ;;  %v527_v24 = vld [vmem:[#allocation7 + $0x60] ss:$8 sps:$4 sm:$0xff]   ;;  %v423_v25 = vld [vmem:[%s751_s2] ss:$0 sm:$0xff] }
  0x40   :  { %v532_v33 = vld [vmem:[#allocation7 + $0x74] ss:$8 sps:$4 sm:$0xff]   ;;  %v530_v34 = vld [vmem:[#allocation7 + $0x70] ss:$8 sps:$4 sm:$0xff]   ;;  %384 = vmatprep.mubr.bf16.mxu0 %v640_v35  ;;  %v264_v46 = vsub.s32 0, %v263_v45  ;;  %v268_v48 = vsub.s32 1, %v263_v45 }
  0x41   :  { %v426_v36 = vld [vmem:[%s753_s4] ss:$0 sm:$0xff]  ;;  %s641_s4 = smov [#allocation8]  }
  0x42   :  { %474 = vmatpush3.bf16.msra.mxu1 %v503_v5  ;;  %355 = vmatpush1.bf16.msra.mxu0 %v512_v14  ;;  %v260_v47 = vld [vmem:[%s755_s6] sm:$0x3]  ;;  %s413_s21 = sshll.u32 %s641_s4, 4  ;;  %s414_s21 = int_to_ptr.vmem [resolvable:$true] %s413_s21 }
  0x43   :  { %475 = vmatprep.subr.bf16.mxu1 %v638_v0  ;;  %356 = vmatprep.subr.bf16.mxu0 %v517_v15  ;;  %v265_v49 = vrot.slane %v260_v47, %v264_v46  ;;  %v269_v50 = vrot.slane %v260_v47, %v268_v48  ;;  %s603_s22 = scalar_lea.vmem %s414_s21, 64  ;;  %p608_p11 = scmp.lt.s32.totalorder %s414_s21, %s414_s21 }
  0x44   :  { %p604_p10 = scmp.ne.s32.totalorder %s414_s21, %s603_s22  ;;  %p609_p12 = scmp.lt.s32.totalorder %s603_s22, %s603_s22 }
  0x46   :  { %476 = vmatpush3.bf16.msra.mxu1 %v504_v6  ;;  %357 = vmatpush1.bf16.msra.mxu0 %v515_v16  ;;  %p610_p13 = por %p609_p12, %p608_p11 }
  0x47   :  { %477 = vmatprep.subr.bf16.mxu1 %v638_v0  ;;  %358 = vmatprep.subr.bf16.mxu0 %v520_v17 }
  0x48   :  { %p611_p0 = pnand %p610_p13, %p604_p10 }
  0x4a   :  { %478 = vmatpush3.bf16.msra.mxu1 %v505_v7  ;;  %359 = vmatpush1.bf16.msra.mxu0 %v518_v18 }
  0x4b   :  { %479 = vmatprep.subr.bf16.mxu1 %v638_v0  ;;  %360 = vmatprep.subr.bf16.mxu0 %v523_v19 }
  0x4e   :  { %480 = vmatpush3.bf16.msra.mxu1 %v506_v8  ;;  %361 = vmatpush1.bf16.msra.mxu0 %v521_v20 }
  0x4f   :  { %481 = vmatprep.subr.bf16.mxu1 %v638_v0  ;;  %362 = vmatprep.subr.bf16.mxu0 %v526_v21 }
  0x52   :  { %482 = vmatpush3.bf16.msra.mxu1 %v507_v9  ;;  %363 = vmatpush1.bf16.msra.mxu0 %v524_v22 }
  0x53   :  { %483 = vmatprep.subr.bf16.mxu1 %v638_v0  ;;  %364 = vmatprep.subr.bf16.mxu0 %v529_v23 }
  0x56   :  { %484 = vmatpush3.bf16.msra.mxu1 %v508_v10  ;;  %365 = vmatpush1.bf16.msra.mxu0 %v527_v24 }
  0x57   :  { %366 = vmatprep.subr.bf16.mxu0 %v532_v33 }
  0x5a   :  { %367 = vmatpush1.bf16.msra.mxu0 %v530_v34 }
 0x110   :  { %v123_v26 = vpop.f32.mrb[0].mxu0 }
 0x111   :  { %v124_v27 = vadd.f32 %v423_v25, %v123_v26  ;;  %v467_v28 = vpop.f32.mrb[1].mxu0 }
 0x112   :  { %v126_v29 = vpop.f32.mrb[2].mxu0 }
 0x113   :  { %v129_v30 = vmax.f32 %v124_v27, 0.0  ;;  %v468_v31 = vpop.f32.mrb[3].mxu0 }
 0x115   :  { %v130_v32 = vpack.c.bf16 %v129_v30, %v129_v30 }
 0x117   :  { %486 = vmatmul.mubr.bf16.vlgmr.msra.gmra.mrb[0].mxu1 %v130_v32 }
 0x1ea   :  { %v236_v37 = vpop.f32.mrb[0].mxu1 }
 0x1eb   :  { %v237_v38 = vadd.f32 %v426_v36, %v236_v37  ;;  %v487_v39 = vpop.f32.mrb[1].mxu1 }
 0x1ec   :  { %v239_v40 = vpop.f32.mrb[2].mxu1 }
 0x1ed   :  { %v242_v41 = vmax.f32 %v237_v38, 0.0  ;;  %v488_v42 = vpop.f32.mrb[3].mxu1 }
 0x1ef   :  { %v243_v43 = vpack.c.bf16 %v242_v41, %v242_v41 }
 0x1f1   :  { %385 = vmatmul.mubr.bf16.vlgmr.msra.gmra.mrb[4].mxu0 %v243_v43 }
 0x2c4   :  { %v386_v51 = vpop.f32.mrb[4].mxu0 }
 0x2c5   :  { %v387_v52 = vadd.f32 %v386_v51, %v265_v49  ;;  %v388_v53 = vpop.f32.mrb[5].mxu0 }
 0x2c6   :  { %v389_v54 = vadd.f32 %v388_v53, %v269_v50  ;;  %v390_v55 = vpop.f32.mrb[6].mxu0 }
 0x2c7   :  { %533 = vtanh.f32 %v387_v52  ;;  %v391_v56 = vpop.f32.mrb[7].mxu0 }
 0x2c8   :  { %535 = vtanh.f32 %v389_v54 }
 0x2d1   :  { %v534_v57 = vpop.eup %533 }
 0x2d2   :  { %v536_v58 = vpop.eup %535 }
 0x2d3   :  { %v397_v59 = vcombine.low %v534_v57, %v536_v58 }
 0x2d5   :  { %451 = vst.sshfl [vmem:[#allocation8] sm:$0x33 pattern:$0x76325410] %v397_v59 }
 0x2d6   :  { %614 = shalt.err (!%p611_p0)
}
 0x2d7   :  { %s615_s24 = scalar_lea.hbm %s756_s7, 64 }
 0x2d8   :  { %p616_p1 = scmp.ne.s32.totalorder %s756_s7, %s615_s24  ;;  %p619_p2 = scmp.lt.u32.totalorder %s615_s24, %s756_s7 }
 0x2da   :  { %p621_p3 = pnand %p619_p2, %p616_p1 }
 0x2dc   :  { %624 = shalt.err (!%p621_p3)
}
 0x2dd   :  { %416 = dma.vmem_to_hbm [thread:$0]  %s414_s21, 64, %s756_s7, [#allocation4]  }
 0x2de   :  { %629 = dma.done.wait [#allocation4], 64  }
 0x2df   :  { %630 = vsyncadd [#allocation4], 4294967232 }
 0x2e0   :  { %420 = vsyncpa [#allocation3], 1 }
 0x2e1   :  { %421 = vsyncpa [#allocation6], 1 }
 0x2e2   :  { %422 = vsyncpa [#allocation4], 1 }

</bundles_post_ra>
